<compile_context>
chip_gen: v5e
topology: v5e:2x2
jax: 0.10.0
libtpu: 0.0.40
codegen_flags: <defaults>
</compile_context>

<pallas_src>
import functools

import jax
import jax.numpy as jnp
from jax import lax
from jax.experimental import pallas as pl
from jax.experimental.pallas import tpu as pltpu


def _apply_act(h, act):
    if act is None:
        return h
    if act == "relu":
        return jnp.maximum(h, 0.0)
    if act == "tanh":
        return jnp.tanh(h)
    raise ValueError(f"unsupported activation: {act}")


def _make_q_mlp_kernel(num_layers: int, act, action_fma: bool):
    """Fused Q-MLP kernel body.

    Ref order after (enc_ref, act_ref):
      w0_enc (E,h1) bf16, w0_act (A,h1) f32|bf16, b0 (1,h1) f32,
      [w_l (h_l,h_{l+1}) bf16, b_l (1,h_{l+1}) f32]  for middle layers,
      w_last8 (8, hk) f32 (row 0 = last weight, rows 1..7 zero),
      b_last (1,1) f32,
      out (1, 1, tile) f32
    """

    def kernel(enc_ref, act_ref, *refs):
        out_ref = refs[-1]
        prefs = refs[:-1]
        w0e, w0a, b0 = prefs[0], prefs[1], prefs[2]

        # ---- layer 0: concat fused by splitting W0. Encoding half feeds the
        #      MXU (bf16 operands, f32 acc); the tiny action half is expanded
        #      as A broadcast FMAs on the VPU in f32.
        h = jnp.dot(enc_ref[...].astype(jnp.bfloat16), w0e[...],
                    preferred_element_type=jnp.float32) + b0[...]
        if action_fma:
            a = act_ref[...].astype(jnp.float32)          # (tile, A)
            wa = w0a[...]                                 # (A, h1) f32
            for j in range(wa.shape[0]):
                h = h + a[:, j:j + 1] * wa[j:j + 1, :]
        else:
            h = h + jnp.dot(act_ref[...].astype(jnp.bfloat16), w0a[...],
                            preferred_element_type=jnp.float32)
        h = _apply_act(h, act)                            # act on f32 accumulator

        # ---- middle hidden layers (bf16 MXU operands, f32 accumulation) ----
        idx = 3
        for _ in range(1, num_layers - 1):
            w, b = prefs[idx], prefs[idx + 1]
            idx += 2
            h = jnp.dot(h.astype(jnp.bfloat16), w[...],
                        preferred_element_type=jnp.float32) + b[...]
            h = _apply_act(h, act)
        # NOTE: the activation feeding the final layer stays f32 — no bf16
        # round-trip before the final contraction.

        # ---- final layer (D_out == 1): contract on the feature axis with the
        #      weight on the LHS so the result is lane-dense (rows of 128
        #      consecutive batch elements) -> unmasked vector stores.
        w8, b_last = prefs[idx], prefs[idx + 1]
        res = lax.dot_general(w8[...], h,
                              dimension_numbers=(((1,), (1,)), ((), ())),
                              preferred_element_type=jnp.float32)   # (8, tile)
        q_row = res[0:1, :] + b_last[...]                            # (1, tile)
        out_ref[...] = q_row[None, :, :].astype(out_ref.dtype)       # (1,1,tile)

    return kernel


def _round_up(x, m):
    return -(-x // m) * m


def pointnet_q_forward(encoding, action, params, *, act="relu",
                       batch_tile: int | None = None):
    """Fused PointNetQModel forward.

    encoding: (B, E) float
    action:   (B, A) float
    params:   list of (W, b); W: (D_in, D_out), b: (1, D_out);
              layer sizes are [E+A, h1, ..., hk, 1].
    returns:  q_value of shape (B,) float32
    """
    B, E = encoding.shape
    B2, A = action.shape
    assert B2 == B
    num_layers = len(params)
    assert num_layers >= 2, "expect >=1 hidden layer plus the output layer"
    assert params[0][0].shape[0] == E + A
    assert params[-1][0].shape[1] == 1

    # ---- batch tile: big tiles (grid-step overhead dominates this tiny MLP),
    #      but >=2 grid steps once the padded batch reaches 2048 rows so a
    #      v7x chip can shard the "parallel" axis across both TensorCores.
    padded = _round_up(B, 128)
    if batch_tile is not None:
        tile = batch_tile
        assert tile % 128 == 0
    elif padded < 2048:
        tile = padded
    else:
        tile = min(4096, max(1024, ((padded // 2) // 128) * 128))
    n_steps = pl.cdiv(B, tile)
    pB = n_steps * tile

    action_fma = A <= 8   # expand tiny action contribution as VPU FMAs

    # ---- weight/bias plumbing (small, resident in VMEM across grid steps).
    w0, b0 = params[0]
    w0e = w0[:E, :].astype(jnp.bfloat16)
    w0a = w0[E:, :].astype(jnp.float32 if action_fma else jnp.bfloat16)
    flat = [w0e, w0a, b0.astype(jnp.float32)]
    for (w, b) in params[1:-1]:
        flat.extend([w.astype(jnp.bfloat16), b.astype(jnp.float32)])
    w_last, b_last = params[-1]
    hk = w_last.shape[0]
    w8 = jnp.zeros((8, hk), jnp.float32).at[0, :].set(
        w_last[:, 0].astype(jnp.float32))
    flat.extend([w8, b_last.astype(jnp.float32).reshape(1, 1)])

    in_specs = [pl.BlockSpec((tile, E), lambda i: (i, 0)),
                pl.BlockSpec((tile, A), lambda i: (i, 0))]
    for arr in flat:
        in_specs.append(pl.BlockSpec(arr.shape, lambda i: (0, 0)))
    out_spec = pl.BlockSpec((1, 1, tile), lambda i: (i, 0, 0))

    # ---- advisory cost estimate for XLA scheduling around the custom call.
    sizes = [E + A] + [w.shape[1] for (w, _) in params]
    flops = 2 * pB * E * sizes[1] + 2 * pB * A * sizes[1]
    for l in range(1, num_layers - 1):
        flops += 2 * pB * sizes[l] * sizes[l + 1]
    flops += 2 * pB * sizes[-2]
    transcendentals = pB * sum(sizes[1:-1]) if act == "tanh" else 0
    bytes_accessed = (encoding.size * encoding.dtype.itemsize
                      + action.size * action.dtype.itemsize
                      + sum(a.size * a.dtype.itemsize for a in flat)
                      + pB * 4)

    kernel = _make_q_mlp_kernel(num_layers, act, action_fma)
    q3d = pl.pallas_call(
        kernel,
        out_shape=jax.ShapeDtypeStruct((n_steps, 1, tile), jnp.float32),
        grid=(n_steps,),
        in_specs=in_specs,
        out_specs=out_spec,
        compiler_params=pltpu.CompilerParams(
            dimension_semantics=("parallel",)),
        cost_estimate=pl.CostEstimate(
            flops=flops, transcendentals=transcendentals,
            bytes_accessed=bytes_accessed),
    )(encoding, action, *flat)

    # .squeeze(-1) from the reference forward; drop the padded tail rows.
    return q3d.reshape(-1)[:B]


def init_params(key, layer_sizes):
    """Deterministic synthetic init for MLP([d0, d1, ..., dL])."""
    params = []
    for l in range(len(layer_sizes) - 1):
        d_in, d_out = layer_sizes[l], layer_sizes[l + 1]
        key, kw, kb = jax.random.split(key, 3)
        scale = 1.0 / jnp.sqrt(jnp.float32(d_in))
        w = jax.random.uniform(kw, (d_in, d_out), jnp.float32, -scale, scale)
        b = jax.random.uniform(kb, (1, d_out), jnp.float32, -scale, scale)
        params.append((w, b))
    return params


def reference_forward_f32(encoding, action, params, act="relu"):
    """Pure-JAX f32 reference matching the PyTorch module semantics."""
    h = jnp.concatenate([encoding, action], axis=1)
    for l, (w, b) in enumerate(params):
        h = h @ w + b
        if l < len(params) - 1:
            h = _apply_act(h, act)
    return h[:, 0]


def reference_forward_mirror(encoding, action, params, act="relu"):
    """Pure-JAX reference mirroring the kernel's mixed-precision path."""
    E = encoding.shape[1]
    w0, b0 = params[0]
    h = (jnp.dot(encoding.astype(jnp.bfloat16), w0[:E].astype(jnp.bfloat16),
                 preferred_element_type=jnp.float32)
         + b0.astype(jnp.float32)
         + action.astype(jnp.float32) @ w0[E:].astype(jnp.float32))
    h = _apply_act(h, act)
    for (w, b) in params[1:-1]:
        h = jnp.dot(h.astype(jnp.bfloat16), w.astype(jnp.bfloat16),
                    preferred_element_type=jnp.float32) + b.astype(jnp.float32)
        h = _apply_act(h, act)
    w_last, b_last = params[-1]
    return (h @ w_last.astype(jnp.float32) + b_last.astype(jnp.float32))[:, 0]


if __name__ == "__main__":
    # Small shapes consistent with the module:
    #   encoding_size=32, action_size=4 (Box action space with shape (4,)),
    #   hidden_sizes=[64, 32], output=1, batch=16.
    B, E, A = 16, 32, 4
    hidden_sizes = [64, 32]
    layer_sizes = [E + A] + hidden_sizes + [1]
    act = "relu"  # hidden_nonlinearity

    key = jax.random.PRNGKey(0)
    k_enc, k_act, k_params = jax.random.split(key, 3)
    encoding = jax.random.normal(k_enc, (B, E), jnp.float32)
    action = jax.random.normal(k_act, (B, A), jnp.float32)
    params = init_params(k_params, layer_sizes)

    fwd = jax.jit(functools.partial(pointnet_q_forward, act=act))
    q = fwd(encoding, action, params)
    jax.block_until_ready(q)

    q_ref_mx = reference_forward_mirror(encoding, action, params, act=act)
    q_ref_32 = reference_forward_f32(encoding, action, params, act=act)
    assert q.shape == (B,), q.shape
    # bf16-operand/f32-acc path: matches the mirrored reference tightly, and
    # the full-f32 PyTorch-equivalent reference to relaxed tolerance.
    assert jnp.allclose(q, q_ref_mx, atol=5e-3, rtol=5e-3), (q, q_ref_mx)
    assert jnp.allclose(q, q_ref_32, atol=5e-2, rtol=5e-2), (q, q_ref_32)

    print("KERNEL_OK")
</pallas_src>

<mosaic_0001>
module attributes {stable_mosaic.version = 11 : i64} {
  func.func @kernel(%arg0: i32, %arg1: memref<128x32xf32, #tpu.memory_space<vmem>>, %arg2: memref<128x4xf32, #tpu.memory_space<vmem>>, %arg3: memref<32x64xbf16, #tpu.memory_space<vmem>>, %arg4: memref<4x64xf32, #tpu.memory_space<vmem>>, %arg5: memref<1x64xf32, #tpu.memory_space<vmem>>, %arg6: memref<64x32xbf16, #tpu.memory_space<vmem>>, %arg7: memref<1x32xf32, #tpu.memory_space<vmem>>, %arg8: memref<8x32xf32, #tpu.memory_space<vmem>>, %arg9: memref<1x1xf32, #tpu.memory_space<vmem>>, %arg10: memref<1x1x128xf32, #tpu.memory_space<vmem>>) attributes {dimension_semantics = [#tpu.dimension_semantics<parallel>], iteration_bounds = array<i64: 1>, scalar_prefetch = 0 : i64, scratch_operands = 0 : i64, tpu.core_type = #tpu.core_type<tc>, window_params = [{transform_indices = @transform_0, window_bounds = array<i64: 128, 32>}, {transform_indices = @transform_1, window_bounds = array<i64: 128, 4>}, {pipeline_mode = #tpu.pipeline_mode<synchronous>, transform_indices = @transform_2, window_bounds = array<i64: 32, 64>}, {pipeline_mode = #tpu.pipeline_mode<synchronous>, transform_indices = @transform_3, window_bounds = array<i64: 4, 64>}, {pipeline_mode = #tpu.pipeline_mode<synchronous>, transform_indices = @transform_4, window_bounds = array<i64: 1, 64>}, {pipeline_mode = #tpu.pipeline_mode<synchronous>, transform_indices = @transform_5, window_bounds = array<i64: 64, 32>}, {pipeline_mode = #tpu.pipeline_mode<synchronous>, transform_indices = @transform_6, window_bounds = array<i64: 1, 32>}, {pipeline_mode = #tpu.pipeline_mode<synchronous>, transform_indices = @transform_7, window_bounds = array<i64: 8, 32>}, {pipeline_mode = #tpu.pipeline_mode<synchronous>, transform_indices = @transform_8, window_bounds = array<i64: 1, 1>}, {transform_indices = @transform_9, window_bounds = array<i64: 1, 1, 128>}]} {
    %c0 = arith.constant 0 : index
    %c0_0 = arith.constant 0 : index
    %0 = vector.load %arg1[%c0, %c0_0] : memref<128x32xf32, #tpu.memory_space<vmem>>, vector<128x32xf32>
    %1 = arith.truncf %0 : vector<128x32xf32> to vector<128x32xbf16>
    %c0_1 = arith.constant 0 : index
    %c0_2 = arith.constant 0 : index
    %2 = vector.load %arg3[%c0_1, %c0_2] : memref<32x64xbf16, #tpu.memory_space<vmem>>, vector<32x64xbf16>
    %cst = arith.constant dense<0.000000e+00> : vector<128x64xf32>
    %3 = tpu.matmul %1, %2, %cst {dimension_numbers = #tpu.dot_dimension_numbers<[1], [0], [0], [1], [0, 0, 1, 1], [], []>} : vector<128x32xbf16>, vector<32x64xbf16>, vector<128x64xf32> -> vector<128x64xf32>
    %c0_3 = arith.constant 0 : index
    %c0_4 = arith.constant 0 : index
    %4 = vector.load %arg5[%c0_3, %c0_4] : memref<1x64xf32, #tpu.memory_space<vmem>>, vector<1x64xf32>
    %5 = vector.broadcast %4 : vector<1x64xf32> to vector<128x64xf32>
    %6 = arith.addf %3, %5 : vector<128x64xf32>
    %c0_5 = arith.constant 0 : index
    %c0_6 = arith.constant 0 : index
    %7 = vector.load %arg2[%c0_5, %c0_6] : memref<128x4xf32, #tpu.memory_space<vmem>>, vector<128x4xf32>
    %c0_7 = arith.constant 0 : index
    %c0_8 = arith.constant 0 : index
    %8 = vector.load %arg4[%c0_7, %c0_8] : memref<4x64xf32, #tpu.memory_space<vmem>>, vector<4x64xf32>
    %9 = vector.extract_strided_slice %7 {offsets = [0, 0], sizes = [128, 1], strides = [1, 1]} : vector<128x4xf32> to vector<128x1xf32>
    %10 = vector.extract_strided_slice %8 {offsets = [0, 0], sizes = [1, 64], strides = [1, 1]} : vector<4x64xf32> to vector<1x64xf32>
    %11 = vector.broadcast %9 : vector<128x1xf32> to vector<128x64xf32>
    %12 = vector.broadcast %10 : vector<1x64xf32> to vector<128x64xf32>
    %13 = arith.mulf %11, %12 : vector<128x64xf32>
    %14 = arith.addf %6, %13 : vector<128x64xf32>
    %15 = vector.extract_strided_slice %7 {offsets = [0, 1], sizes = [128, 1], strides = [1, 1]} : vector<128x4xf32> to vector<128x1xf32>
    %16 = vector.extract_strided_slice %8 {offsets = [1, 0], sizes = [1, 64], strides = [1, 1]} : vector<4x64xf32> to vector<1x64xf32>
    %17 = vector.broadcast %15 : vector<128x1xf32> to vector<128x64xf32>
    %18 = vector.broadcast %16 : vector<1x64xf32> to vector<128x64xf32>
    %19 = arith.mulf %17, %18 : vector<128x64xf32>
    %20 = arith.addf %14, %19 : vector<128x64xf32>
    %21 = vector.extract_strided_slice %7 {offsets = [0, 2], sizes = [128, 1], strides = [1, 1]} : vector<128x4xf32> to vector<128x1xf32>
    %22 = vector.extract_strided_slice %8 {offsets = [2, 0], sizes = [1, 64], strides = [1, 1]} : vector<4x64xf32> to vector<1x64xf32>
    %23 = vector.broadcast %21 : vector<128x1xf32> to vector<128x64xf32>
    %24 = vector.broadcast %22 : vector<1x64xf32> to vector<128x64xf32>
    %25 = arith.mulf %23, %24 : vector<128x64xf32>
    %26 = arith.addf %20, %25 : vector<128x64xf32>
    %27 = vector.extract_strided_slice %7 {offsets = [0, 3], sizes = [128, 1], strides = [1, 1]} : vector<128x4xf32> to vector<128x1xf32>
    %28 = vector.extract_strided_slice %8 {offsets = [3, 0], sizes = [1, 64], strides = [1, 1]} : vector<4x64xf32> to vector<1x64xf32>
    %29 = vector.broadcast %27 : vector<128x1xf32> to vector<128x64xf32>
    %30 = vector.broadcast %28 : vector<1x64xf32> to vector<128x64xf32>
    %31 = arith.mulf %29, %30 : vector<128x64xf32>
    %32 = arith.addf %26, %31 : vector<128x64xf32>
    %cst_9 = arith.constant 0.000000e+00 : f32
    %33 = vector.broadcast %cst_9 : f32 to vector<128x64xf32>
    %34 = arith.maximumf %32, %33 : vector<128x64xf32>
    %35 = arith.truncf %34 : vector<128x64xf32> to vector<128x64xbf16>
    %c0_10 = arith.constant 0 : index
    %c0_11 = arith.constant 0 : index
    %36 = vector.load %arg6[%c0_10, %c0_11] : memref<64x32xbf16, #tpu.memory_space<vmem>>, vector<64x32xbf16>
    %cst_12 = arith.constant dense<0.000000e+00> : vector<128x32xf32>
    %37 = tpu.matmul %35, %36, %cst_12 {dimension_numbers = #tpu.dot_dimension_numbers<[1], [0], [0], [1], [0, 0, 1, 1], [], []>} : vector<128x64xbf16>, vector<64x32xbf16>, vector<128x32xf32> -> vector<128x32xf32>
    %c0_13 = arith.constant 0 : index
    %c0_14 = arith.constant 0 : index
    %38 = vector.load %arg7[%c0_13, %c0_14] : memref<1x32xf32, #tpu.memory_space<vmem>>, vector<1x32xf32>
    %39 = vector.broadcast %38 : vector<1x32xf32> to vector<128x32xf32>
    %40 = arith.addf %37, %39 : vector<128x32xf32>
    %cst_15 = arith.constant 0.000000e+00 : f32
    %41 = vector.broadcast %cst_15 : f32 to vector<128x32xf32>
    %42 = arith.maximumf %40, %41 : vector<128x32xf32>
    %c0_16 = arith.constant 0 : index
    %c0_17 = arith.constant 0 : index
    %43 = vector.load %arg8[%c0_16, %c0_17] : memref<8x32xf32, #tpu.memory_space<vmem>>, vector<8x32xf32>
    %cst_18 = arith.constant dense<0.000000e+00> : vector<8x128xf32>
    %44 = tpu.matmul %43, %42, %cst_18 {dimension_numbers = #tpu.dot_dimension_numbers<[1], [1], [0], [0], [0, 0, 1, 0], [], []>} : vector<8x32xf32>, vector<128x32xf32>, vector<8x128xf32> -> vector<8x128xf32>
    %45 = vector.extract_strided_slice %44 {offsets = [0, 0], sizes = [1, 128], strides = [1, 1]} : vector<8x128xf32> to vector<1x128xf32>
    %c0_19 = arith.constant 0 : index
    %c0_20 = arith.constant 0 : index
    %46 = vector.load %arg9[%c0_19, %c0_20] : memref<1x1xf32, #tpu.memory_space<vmem>>, vector<1x1xf32>
    %47 = vector.broadcast %46 : vector<1x1xf32> to vector<1x128xf32>
    %48 = arith.addf %45, %47 : vector<1x128xf32>
    %49 = vector.shape_cast %48 : vector<1x128xf32> to vector<1x1x128xf32>
    %c0_21 = arith.constant 0 : index
    %c0_22 = arith.constant 0 : index
    %c0_23 = arith.constant 0 : index
    %50 = vector.load %arg10[%c0_21, %c0_22, %c0_23] : memref<1x1x128xf32, #tpu.memory_space<vmem>>, vector<1x1x128xf32>
    tpu.vector_store %arg10[%c0_21, %c0_22, %c0_23], %49 {strides = array<i32>} : memref<1x1x128xf32, #tpu.memory_space<vmem>>, vector<1x1x128xf32>,
    return
  }
  func.func @transform_0(%arg0: i32) -> (i32, i32) {
    %c0_i32 = arith.constant 0 : i32
    %c0_i32_0 = arith.constant 0 : i32
    return %arg0, %c0_i32 : i32, i32
  }
  func.func @transform_1(%arg0: i32) -> (i32, i32) {
    %c0_i32 = arith.constant 0 : i32
    %c0_i32_0 = arith.constant 0 : i32
    return %arg0, %c0_i32 : i32, i32
  }
  func.func @transform_2(%arg0: i32) -> (i32, i32) {
    %c0_i32 = arith.constant 0 : i32
    %c0_i32_0 = arith.constant 0 : i32
    %c0_i32_1 = arith.constant 0 : i32
    return %c0_i32, %c0_i32_0 : i32, i32
  }
  func.func @transform_3(%arg0: i32) -> (i32, i32) {
    %c0_i32 = arith.constant 0 : i32
    %c0_i32_0 = arith.constant 0 : i32
    %c0_i32_1 = arith.constant 0 : i32
    return %c0_i32, %c0_i32_0 : i32, i32
  }
  func.func @transform_4(%arg0: i32) -> (i32, i32) {
    %c0_i32 = arith.constant 0 : i32
    %c0_i32_0 = arith.constant 0 : i32
    %c0_i32_1 = arith.constant 0 : i32
    return %c0_i32, %c0_i32_0 : i32, i32
  }
  func.func @transform_5(%arg0: i32) -> (i32, i32) {
    %c0_i32 = arith.constant 0 : i32
    %c0_i32_0 = arith.constant 0 : i32
    %c0_i32_1 = arith.constant 0 : i32
    return %c0_i32, %c0_i32_0 : i32, i32
  }
  func.func @transform_6(%arg0: i32) -> (i32, i32) {
    %c0_i32 = arith.constant 0 : i32
    %c0_i32_0 = arith.constant 0 : i32
    %c0_i32_1 = arith.constant 0 : i32
    return %c0_i32, %c0_i32_0 : i32, i32
  }
  func.func @transform_7(%arg0: i32) -> (i32, i32) {
    %c0_i32 = arith.constant 0 : i32
    %c0_i32_0 = arith.constant 0 : i32
    %c0_i32_1 = arith.constant 0 : i32
    return %c0_i32, %c0_i32_0 : i32, i32
  }
  func.func @transform_8(%arg0: i32) -> (i32, i32) {
    %c0_i32 = arith.constant 0 : i32
    %c0_i32_0 = arith.constant 0 : i32
    %c0_i32_1 = arith.constant 0 : i32
    return %c0_i32, %c0_i32_0 : i32, i32
  }
  func.func @transform_9(%arg0: i32) -> (i32, i32, i32) {
    %c0_i32 = arith.constant 0 : i32
    %c0_i32_0 = arith.constant 0 : i32
    %c0_i32_1 = arith.constant 0 : i32
    return %arg0, %c0_i32, %c0_i32_0 : i32, i32, i32
  }
}

</mosaic_0001>

<bundles_post_ra>
// kernel: pointnet_q_forward.1
= control target key start
LH: loop header
LB: loop body
LE: loop exit
PB: predicated region body
PF: predicated region fallthrough
CT: control target
= control target key end

     0   :  { %v939_v0 = vmov 2   ;;  %v940_v1 = vmov 1   ;;  %v941_v4 = vmov 0   ;;  %vm79_vm0 = vcmask 261120   ;;  %s1426_s1 = inlined_call_operand.vmem [shape: f32[16,4], index: 1, kind: input, shape index: {}]   ;;  %s1427_s2 = inlined_call_operand.vmem [shape: bf16[32,64], index: 2, kind: input, shape index: {}]   ;;  %s1428_s0 = inlined_call_operand.vmem [shape: f32[16,32], index: 0, kind: input, shape index: {}]   ;;  %s1429_s4 = inlined_call_operand.vmem [shape: f32[1,64], index: 4, kind: input, shape index: {}]   ;;  %s1430_s5 = inlined_call_operand.vmem [shape: bf16[64,32], index: 5, kind: input, shape index: {}]   ;;  %s1431_s3 = inlined_call_operand.vmem [shape: f32[4,64], index: 3, kind: input, shape index: {}]   ;;  %s1432_s6 = inlined_call_operand.vmem [shape: f32[1,32], index: 6, kind: input, shape index: {}]   ;;  %s1433_s8 = inlined_call_operand.<no memory space> [shape: f32[1,1], index: 8, kind: input, shape index: {}]   ;;  %s1434_s7 = inlined_call_operand.vmem [shape: f32[8,32], index: 7, kind: input, shape index: {}]   ;;  %s1435_s9 = inlined_call_operand.vmem [shape: f32[1,1,128], index: 9, kind: output, shape index: {}]  }
   0x1   :  { %890 = vset.pattern.permute.xlu2 %v939_v0  ;;  %889 = vset.pattern.permute.xlu1 %v940_v1  ;;  %v998_v2 = vld [vmem:[%s1426_s1 + $0x50] sm:$0xff]  ;;  %v867_v3 = vld [vmem:[%s1427_s2 + $0x8] sm:$0xff]  ;;  %v866_v5 = vld [vmem:[%s1427_s2] sm:$0xff]  ;;  %v942_v14 = vmov 3   ;;  %vm634_vm1 = vcmask 523264  }
   0x2   :  { %888 = vset.pattern.permute.xlu0 %v941_v4  ;;  %421 = vperm.xlu2 %890, %v998_v2   ;;  %v35_v6 = vld [vmem:[%s1428_s0] sm:$0xff]  ;;  %v36_v7 = vld [vmem:[%s1428_s0 + $0x8] sm:$0xff]  ;;  %v41_v8 = vld [vmem:[%s1428_s0 + $0x30] sm:$0xff] }
   0x3   :  { %324 = vperm.xlu1 %889, %v998_v2   ;;  %222 = vperm.xlu0 %888, %v998_v2   ;;  %v42_v9 = vld [vmem:[%s1428_s0 + $0x38] sm:$0xff]  ;;  %v51_v11 = vpack.c.bf16 %v36_v7, %v35_v6  ;;  %v155_v13 = vld [vmem:[%s1426_s1 + $0x10] sm:$0xff]  ;;  %v43_v17 = vld [vmem:[%s1428_s0 + $0x40] sm:$0xff] }
   0x4   :  { %110 = vmatpush.bf16.msra.mxu0 %v867_v3  ;;  %872 = vmatpush.bf16.msra.mxu2 %v867_v3  ;;  %v164_v10 = vld [vmem:[%s1426_s1 + $0x58] sm:$0xff]  ;;  %v54_v12 = vpack.c.bf16 %v42_v9, %v41_v8  ;;  %v37_v15 = vld [vmem:[%s1428_s0 + $0x10] sm:$0xff]  ;;  %v44_v18 = vld [vmem:[%s1428_s0 + $0x48] sm:$0xff] }
   0x5   :  { %873 = vmatpush.bf16.msra.mxu3 %v867_v3  ;;  %v38_v16 = vld [vmem:[%s1428_s0 + $0x18] sm:$0xff]  ;;  %v165_v20 = vld [vmem:[%s1426_s1 + $0x60] sm:$0xff]  ;;  %v55_v21 = vpack.c.bf16 %v44_v18, %v43_v17  ;;  %v49_v24 = vld [vmem:[%s1428_s0 + $0x70] sm:$0xff] }
   0x6   :  { %v52_v19 = vpack.c.bf16 %v38_v16, %v37_v15  ;;  %v156_v22 = vld [vmem:[%s1426_s1 + $0x18] sm:$0xff]  ;;  %v39_v27 = vld [vmem:[%s1428_s0 + $0x20] sm:$0xff]  ;;  %v40_v28 = vld [vmem:[%s1428_s0 + $0x28] sm:$0xff] }
   0x7   :  { %v1056_v23 = vld [vmem:[%s1426_s1 + $0x78] sm:$0xff]  ;;  %v45_v29 = vld [vmem:[%s1428_s0 + $0x50] sm:$0xff]  ;;  %v53_v31 = vpack.c.bf16 %v40_v28, %v39_v27  ;;  %v166_v33 = vld [vmem:[%s1426_s1 + $0x68] sm:$0xff] }
   0x8   :  { %111 = vmatpush.bf16.msra.mxu0 %v866_v5  ;;  %874 = vmatpush.bf16.msra.mxu2 %v866_v5  ;;  %v50_v25 = vld [vmem:[%s1428_s0 + $0x78] sm:$0xff]  ;;  %v157_v34 = vld [vmem:[%s1426_s1 + $0x20] sm:$0xff]  ;;  %v48_v36 = vld [vmem:[%s1428_s0 + $0x68] sm:$0xff] }
   0x9   :  { %875 = vmatpush.bf16.msra.mxu3 %v866_v5  ;;  %v58_v26 = vpack.c.bf16 %v50_v25, %v49_v24  ;;  %v46_v30 = vld [vmem:[%s1428_s0 + $0x58] sm:$0xff]  ;;  %v47_v35 = vld [vmem:[%s1428_s0 + $0x60] sm:$0xff]  ;;  %v167_v38 = vld [vmem:[%s1426_s1 + $0x70] sm:$0xff] }
   0xa   :  { %425 = vperm.xlu2 %890, %v164_v10   ;;  %v56_v32 = vpack.c.bf16 %v46_v30, %v45_v29  ;;  %v57_v37 = vpack.c.bf16 %v48_v36, %v47_v35  ;;  %v1110_v39 = vld [vmem:[%s1426_s1 + $0x38] sm:$0xff]  ;;  %v158_v40 = vld [vmem:[%s1426_s1 + $0x28] sm:$0xff]  ;;  %v1121_v41 = vld [vmem:[%s1426_s1 + $0x30] sm:$0xff] }
   0xb   :  { %328 = vperm.xlu1 %889, %v164_v10   ;;  %227 = vperm.xlu0 %888, %v164_v10   ;;  %v1132_v43 = vld [vmem:[%s1426_s1 + $0x48] sm:$0xff]  ;;  %v1143_v45 = vld [vmem:[%s1426_s1] sm:$0xff]  ;;  %v871_v53 = vld [vmem:[%s1430_s5 + $0x18] sm:$0xff] }
   0xc   :  { %817 = vmatmul.msk.bf16.vlgmr.msra.gmra.mxu0 %vm79_vm0, %v51_v11  ;;  %820 = vmatmul.msk.bf16.vlgmr.msra.gmra.mxu2 %vm79_vm0, %v54_v12  ;;  %v1177_v55 = vld [vmem:[%s1429_s4] ss:$0 sm:$0xff]  ;;  %v870_v59 = vld [vmem:[%s1430_s5 + $0x10] sm:$0xff]  ;;  %v869_v61 = vld [vmem:[%s1430_s5 + $0x8] sm:$0xff] }
   0xd   :  { %824 = vmatmul.msk.bf16.vlgmr.msra.gmra.mxu3 %vm79_vm0, %v58_v26  ;;  %876 = vmatpush.bf16.msra.mxu1 %v871_v53  ;;  %v868_v6 = vld [vmem:[%s1430_s5] sm:$0xff] }
   0xe   :  { %877 = vmatpush.bf16.msrb.mxu3 %v871_v53  ;;  %663 = vmatpush.bf16.msrb.mxu0 %v871_v53  ;;  %v169_v12 = vld [vmem:[%s1431_s3] sm:$0xf] }
   0xf   :  { %v1217_v15 = vperm.slane %v169_v12, 0  ;;  %v1223_v18 = vld [vmem:[%s1426_s1 + $0x40] sm:$0xff]  ;;  %v1240_v27 = vperm.slane %v169_v12, 2 }
  0x11   :  { %878 = vmatpush.bf16.msra.mxu1 %v870_v59 }
  0x12   :  { %892 = vset.pattern.permute.xlu2 %v941_v4  ;;  %879 = vmatpush.bf16.msrb.mxu3 %v870_v59 }
  0x13   :  { %891 = vset.pattern.permute.xlu1 %v942_v14  ;;  %896 = vset.pattern.permute.xlu0 %v939_v0 }
  0x14   :  { %522 = vperm.xlu1 %891, %v164_v10   ;;  %389 = vperm.xlu0 %896, %v155_v13  }
  0x15   :  { %182 = vperm.xlu2 %892, %v155_v13   ;;  %664 = vmatpush.bf16.msrb.mxu0 %v870_v59 }
  0x16   :  { %880 = vmatpush.bf16.msra.mxu1 %v869_v61  ;;  %881 = vmatpush.bf16.msrb.mxu3 %v869_v61 }
  0x19   :  { %665 = vmatpush.bf16.msrb.mxu0 %v869_v61 }
  0x1a   :  { %882 = vmatpush.bf16.msra.mxu1 %v868_v6  ;;  %883 = vmatpush.bf16.msrb.mxu3 %v868_v6 }
  0x1c   :  { %893 = vset.pattern.permute.xlu1 %v941_v4  ;;  %905 = vset.pattern.permute.xlu0 %v940_v1 }
  0x1d   :  { %232 = vperm.xlu2 %892, %v165_v20   ;;  %818 = vmatmul.msk.bf16.gmra.mxu0 %vm79_vm0, %v52_v19 }
  0x1e   :  { %821 = vmatmul.msk.bf16.gmra.mxu2 %vm79_vm0, %v55_v21  ;;  %187 = vperm.xlu1 %893, %v156_v22   ;;  %v1231_v21 = vperm.slane %v169_v12, 1 }
  0x1f   :  { %344 = vperm.xlu0 %905, %v1056_v23   ;;  %666 = vmatpush.bf16.msrb.mxu0 %v868_v6 }
  0x25   :  { %895 = vset.pattern.permute.xlu2 %v940_v1 }
  0x26   :  { %894 = vset.pattern.permute.xlu1 %v940_v1  ;;  %296 = vperm.xlu2 %895, %v156_v22  }
  0x27   :  { %906 = vset.pattern.permute.xlu0 %v942_v14  ;;  %292 = vperm.xlu1 %894, %v155_v13  }
  0x28   :  { %518 = vperm.xlu0 %906, %v998_v2  }
  0x2d   :  { %819 = vmatmul.msk.bf16.gmra.mxu0 %vm79_vm0, %v53_v31 }
  0x2e   :  { %822 = vmatmul.msk.bf16.gmra.mxu2 %vm79_vm0, %v56_v32  ;;  %336 = vperm.xlu2 %895, %v166_v33  }
  0x2f   :  { %332 = vperm.xlu1 %894, %v165_v20  }
  0x30   :  { %490 = vperm.xlu0 %906, %v156_v22  }
  0x36   :  { %898 = vset.pattern.permute.xlu2 %v939_v0 }
  0x37   :  { %897 = vset.pattern.permute.xlu1 %v939_v0  ;;  %429 = vperm.xlu2 %898, %v165_v20  }
  0x38   :  { %494 = vperm.xlu0 %906, %v157_v34   ;;  %393 = vperm.xlu1 %897, %v156_v22  }
  0x3e   :  { %823 = vmatmul.msk.bf16.gmra.mxu2 %vm79_vm0, %v57_v37 }
  0x3f   :  { %899 = vset.pattern.permute.xlu2 %v942_v14 }
  0x40   :  { %909 = vset.pattern.permute.xlu0 %v941_v4  ;;  %433 = vperm.xlu1 %897, %v166_v33  }
  0x41   :  { %237 = vperm.xlu0 %909, %v166_v33   ;;  %486 = vperm.xlu2 %899, %v155_v13  }
  0x48   :  { %900 = vset.pattern.permute.xlu1 %v942_v14 }
  0x49   :  { %242 = vperm.xlu0 %909, %v167_v38   ;;  %530 = vperm.xlu2 %899, %v166_v33   ;;  %v1249_v33 = vld [vmem:[%s1426_s1 + $0x8] sm:$0xff] }
  0x4a   :  { %526 = vperm.xlu1 %900, %v165_v20  }
  0x51   :  { %207 = vperm.xlu0 %909, %v1110_v39   ;;  %902 = vset.pattern.permute.xlu2 %v941_v4 }
  0x52   :  { %901 = vset.pattern.permute.xlu1 %v941_v4  ;;  %197 = vperm.xlu2 %902, %v158_v40  }
  0x53   :  { %192 = vperm.xlu1 %901, %v157_v34  }
  0x59   :  { %917 = vset.pattern.permute.xlu0 %v942_v14 }
  0x5a   :  { %903 = vset.pattern.permute.xlu2 %v940_v1  ;;  %502 = vperm.xlu0 %917, %v1121_v41  }
  0x5b   :  { %247 = vperm.xlu1 %901, %v1056_v23   ;;  %300 = vperm.xlu2 %903, %v157_v34  }
  0x5c   :  { %v1127_v42 = vpop.permute.xlu2 %421 }
  0x62   :  { %922 = vset.pattern.permute.xlu0 %v940_v1 }
  0x63   :  { %904 = vset.pattern.permute.xlu1 %v940_v1  ;;  %340 = vperm.xlu2 %903, %v167_v38  }
  0x64   :  { %304 = vperm.xlu1 %904, %v158_v40   ;;  %320 = vperm.xlu0 %922, %v1132_v43   ;;  %v1137_v44 = vpop.permute.xlu2 %425 }
  0x6b   :  { %908 = vset.pattern.permute.xlu2 %v939_v0 }
  0x6c   :  { %907 = vset.pattern.permute.xlu1 %v939_v0  ;;  %401 = vperm.xlu2 %908, %v158_v40  }
  0x6d   :  { %927 = vset.pattern.permute.xlu0 %v941_v4  ;;  %397 = vperm.xlu1 %907, %v157_v34   ;;  %v1252_v34 = vperm.slane %v169_v12, 3 }
  0x6e   :  { %172 = vperm.xlu0 %927, %v1143_v45  }
  0x6f   :  { %v1148_v46 = vpop.permute.xlu2 %182 }
  0x70   :  { %v253_v19 = vmul.f32 %v1217_v15, %v1148_v46 }
  0x74   :  { %441 = vperm.xlu2 %908, %v1056_v23  }
  0x75   :  { %437 = vperm.xlu1 %907, %v167_v38   ;;  %v1151_v47 = vpop.permute.xlu1 %324  ;;  %v1156_v49 = vpop.permute.xlu0 %222 }
  0x76   :  { %932 = vset.pattern.permute.xlu0 %v939_v0 }
  0x77   :  { %v1154_v48 = vpop.permute.xlu2 %232  ;;  %385 = vperm.xlu0 %932, %v1249_v33  }
  0x7c   :  { %911 = vset.pattern.permute.xlu2 %v942_v14 }
  0x7d   :  { %910 = vset.pattern.permute.xlu1 %v942_v14  ;;  %534 = vperm.xlu2 %911, %v167_v38   ;;  %v1160_v50 = vpop.permute.xlu1 %328  ;;  %v1164_v52 = vpop.permute.xlu0 %227 }
  0x7e   :  { %498 = vperm.xlu1 %910, %v158_v40  }
  0x7f   :  { %936 = vset.pattern.permute.xlu0 %v941_v4 }
  0x80   :  { %v1162_v51 = vpop.permute.xlu2 %296 }
  0x81   :  { %v351_v37 = vmul.f32 %v1231_v21, %v1162_v51 }
  0x85   :  { %912 = vset.pattern.permute.xlu2 %v941_v4 }
  0x86   :  { %538 = vperm.xlu1 %910, %v1056_v23   ;;  %202 = vperm.xlu2 %912, %v1121_v41   ;;  %v1172_v54 = vpop.permute.xlu1 %522  ;;  %v390_v60 = vpop.permute.xlu0 %389 }
  0x87   :  { %v447_v30 = vmul.f32 %v1240_v27, %v390_v60 }
  0x88   :  { %v1179_v57 = vpop.permute.xlu2 %336 }
  0x89   :  { %v113_v56 = vpop.f32.mrf.mxu0 }
  0x8a   :  { %v1182_v58 = vadd.f32 %v1177_v55, %v113_v56 }
  0x8e   :  { %913 = vset.pattern.permute.xlu1 %v940_v1  ;;  %914 = vset.pattern.permute.xlu2 %v940_v1 }
  0x8f   :  { %308 = vperm.xlu1 %913, %v1121_v41   ;;  %312 = vperm.xlu2 %914, %v1110_v39   ;;  %v128_v62 = vpop.f32.mrf.mxu2 }
  0x90   :  { %v188_v63 = vpop.permute.xlu1 %187  ;;  %v1195_v2 = vadd.f32 %v1177_v55, %v128_v62 }
  0x91   :  { %v115_v3 = vpop.f32.mrf.mxu0  ;;  %v1203_v7 = vpop.permute.xlu2 %429  ;;  %v254_v31 = vmul.f32 %v1217_v15, %v188_v63  ;;  %v261_v63 = vmul.f32 %v1217_v15, %v1156_v49  ;;  %v358_v49 = vmul.f32 %v1231_v21, %v1151_v47  ;;  %v359_v47 = vmul.f32 %v1231_v21, %v1160_v50 }
  0x92   :  { %v1198_v5 = vadd.f32 %v1177_v55, %v115_v3  ;;  %v1205_v8 = vpop.permute.xlu0 %344  ;;  %v553_v50 = vmul.f32 %v1252_v34, %v1172_v54 }
  0x97   :  { %915 = vset.pattern.permute.xlu1 %v939_v0  ;;  %916 = vset.pattern.permute.xlu2 %v939_v0  ;;  %v130_v9 = vpop.f32.mrf.mxu2 }
  0x98   :  { %405 = vperm.xlu1 %915, %v1121_v41   ;;  %409 = vperm.xlu2 %916, %v1110_v39   ;;  %v1212_v10 = vadd.f32 %v1177_v55, %v130_v9 }
  0x99   :  { %v293_v11 = vpop.permute.xlu1 %292 }
  0x9a   :  { %v118_v13 = vpop.f32.mrf.mxu0  ;;  %v1227_v20 = vpop.permute.xlu0 %518  ;;  %v350_v28 = vmul.f32 %v1231_v21, %v293_v11 }
  0x9b   :  { %v119_v16 = vadd.f32 %v1177_v55, %v118_v13  ;;  %v487_v17 = vpop.permute.xlu2 %486 }
  0x9d   :  { %v269_v22 = vadd.f32 %v253_v19, %v119_v16  ;;  %v455_v19 = vmul.f32 %v1240_v27, %v1127_v42  ;;  %v552_v42 = vmul.f32 %v1252_v34, %v1227_v20 }
  0x9f   :  { %v366_v32 = vadd.f32 %v350_v28, %v269_v22 }
  0xa0   :  { %918 = vset.pattern.permute.xlu1 %v942_v14  ;;  %919 = vset.pattern.permute.xlu2 %v941_v4 }
  0xa1   :  { %506 = vperm.xlu1 %918, %v1110_v39   ;;  %212 = vperm.xlu2 %919, %v1223_v18   ;;  %v133_v23 = vpop.f32.mrf.mxu2  ;;  %v1235_v24 = vpop.permute.xlu1 %332  ;;  %v463_v38 = vadd.f32 %v447_v30, %v366_v32  ;;  %v544_v39 = vmul.f32 %v1252_v34, %v487_v17 }
  0xa2   :  { %v1238_v25 = vadd.f32 %v1177_v55, %v133_v23  ;;  %v120_v26 = vpop.f32.mrf.mxu0  ;;  %v491_v41 = vpop.permute.xlu0 %490  ;;  %v262_v23 = vmul.f32 %v1217_v15, %v1164_v52 }
  0xa3   :  { %v121_v29 = vadd.f32 %v1177_v55, %v120_v26  ;;  %v1254_v36 = vpop.permute.xlu2 %530  ;;  %v545_v56 = vmul.f32 %v1252_v34, %v491_v41  ;;  %v560_v60 = vadd.f32 %v544_v39, %v463_v38  ;;  %v1300_v38 = vpop.f32.mrf.mxu3 }
  0xa5   :  { %v270_v35 = vadd.f32 %v254_v31, %v121_v29  ;;  %v576_v3 = vmax.f32 %v560_v60, 0.0 }
  0xa7   :  { %v367_v51 = vadd.f32 %v351_v37, %v270_v35  ;;  %v456_v35 = vmul.f32 %v1240_v27, %v1137_v44 }
  0xa9   :  { %920 = vset.pattern.permute.xlu1 %v941_v4  ;;  %921 = vset.pattern.permute.xlu2 %v940_v1  ;;  %v135_v40 = vpop.f32.mrf.mxu2 }
  0xaa   :  { %v1262_v46 = vadd.f32 %v1177_v55, %v135_v40  ;;  %217 = vperm.xlu1 %920, %v1132_v43   ;;  %316 = vperm.xlu2 %921, %v1223_v18   ;;  %v394_v53 = vpop.permute.xlu1 %393  ;;  %v1296_v32 = vpop.permute.xlu0 %494 }
  0xab   :  { %v448_v59 = vmul.f32 %v1240_v27, %v394_v53 }
  0xac   :  { %v1271_v9 = vpop.permute.xlu2 %197 }
  0xad   :  { %v464_v61 = vadd.f32 %v448_v59, %v367_v51 }
  0xaf   :  { %v561_v62 = vadd.f32 %v545_v56, %v464_v61 }
  0xb1   :  { %v577_v6 = vmax.f32 %v561_v62, 0.0  ;;  %v138_v11 = vpop.f32.mrf.mxu2 }
  0xb2   :  { %v139_v12 = vadd.f32 %v1177_v55, %v138_v11  ;;  %923 = vset.pattern.permute.xlu1 %v939_v0  ;;  %924 = vset.pattern.permute.xlu2 %v939_v0  ;;  %v434_v13 = vpop.permute.xlu1 %433 }
  0xb3   :  { %413 = vperm.xlu1 %923, %v1223_v18   ;;  %417 = vperm.xlu2 %924, %v1132_v43   ;;  %v591_v16 = vpack.c.bf16 %v577_v6, %v576_v3  ;;  %v238_v60 = vpop.permute.xlu0 %237  ;;  %v150_v3 = vpop.f32.mrf.mxu3  ;;  %v457_v6 = vmul.f32 %v1240_v27, %v1203_v7 }
  0xb4   :  { %v277_v17 = vadd.f32 %v261_v63, %v139_v12  ;;  %v264_v61 = vmul.f32 %v1217_v15, %v238_v60  ;;  %v361_v12 = vmul.f32 %v1231_v21, %v1179_v57 }
  0xb5   :  { %842 = vmatmul.msk.bf16.vlgmr.msra.gmra.mxu1 %vm634_vm1, %v591_v16  ;;  %v1286_v30 = vpop.permute.xlu2 %300 }
  0xb6   :  { %v374_v22 = vadd.f32 %v358_v49, %v277_v17  ;;  %v363_v17 = vmul.f32 %v1231_v21, %v1205_v8  ;;  %v555_v8 = vmul.f32 %v1252_v34, %v1254_v36 }
  0xb8   :  { %v471_v26 = vadd.f32 %v455_v19, %v374_v22  ;;  %v458_v19 = vmul.f32 %v1240_v27, %v434_v13 }
  0xb9   :  { %v140_v28 = vpop.f32.mrf.mxu2 }
  0xba   :  { %v141_v29 = vadd.f32 %v1177_v55, %v140_v28  ;;  %v568_v39 = vadd.f32 %v552_v42, %v471_v26 }
  0xbb   :  { %925 = vset.pattern.permute.xlu1 %v942_v14  ;;  %926 = vset.pattern.permute.xlu2 %v942_v14 }
  0xbc   :  { %v278_v31 = vadd.f32 %v262_v23, %v141_v29  ;;  %510 = vperm.xlu1 %925, %v1223_v18   ;;  %v527_v52 = vpop.permute.xlu1 %526  ;;  %514 = vperm.xlu2 %926, %v1132_v43   ;;  %v263_v18 = vmul.f32 %v1217_v15, %v1154_v48  ;;  %v584_v53 = vmax.f32 %v568_v39, 0.0  ;;  %v360_v48 = vmul.f32 %v1231_v21, %v1235_v24 }
  0xbd   :  { %v1309_v44 = vpop.permute.xlu2 %340  ;;  %v151_v24 = vadd.f32 %v1177_v55, %v150_v3  ;;  %v554_v7 = vmul.f32 %v1252_v34, %v527_v52 }
  0xbe   :  { %v375_v37 = vadd.f32 %v359_v47, %v278_v31 }
  0xc0   :  { %v472_v40 = vadd.f32 %v456_v35, %v375_v37  ;;  %v123_v35 = vpop.f32.mrf.mxu0 }
  0xc1   :  { %v143_v20 = vpop.f32.mrf.mxu2 }
  0xc2   :  { %v569_v41 = vadd.f32 %v553_v50, %v472_v40  ;;  %v144_v43 = vadd.f32 %v1177_v55, %v143_v20  ;;  %v124_v50 = vadd.f32 %v1177_v55, %v123_v35 }
  0xc4   :  { %v585_v56 = vmax.f32 %v569_v41, 0.0  ;;  %v279_v51 = vadd.f32 %v263_v18, %v144_v43  ;;  %928 = vset.pattern.permute.xlu1 %v941_v4  ;;  %929 = vset.pattern.permute.xlu2 %v940_v1 }
  0xc5   :  { %v193_v59 = vpop.permute.xlu1 %192  ;;  %177 = vperm.xlu1 %928, %v1249_v33   ;;  %284 = vperm.xlu2 %929, %v1143_v45  }
  0xc6   :  { %v595_v54 = vpack.c.bf16 %v585_v56, %v584_v53  ;;  %v376_v62 = vadd.f32 %v360_v48, %v279_v51  ;;  %v402_v57 = vpop.permute.xlu2 %401  ;;  %v255_v39 = vmul.f32 %v1217_v15, %v193_v59  ;;  %v243_v53 = vpop.permute.xlu0 %242  ;;  %v149_v59 = vadd.f32 %v1177_v55, %v1300_v38 }
  0xc7   :  { %v265_v56 = vmul.f32 %v1217_v15, %v243_v53 }
  0xc8   :  { %846 = vmatmul.msk.bf16.vlgmr.msrb.gmra.mxu3 %vm634_vm1, %v595_v54  ;;  %v473_v16 = vadd.f32 %v457_v6, %v376_v62  ;;  %v125_v20 = vpop.f32.mrf.mxu0  ;;  %v271_v18 = vadd.f32 %v255_v39, %v124_v50  ;;  %v362_v62 = vmul.f32 %v1231_v21, %v1309_v44 }
  0xc9   :  { %v145_v63 = vpop.f32.mrf.mxu2 }
  0xca   :  { %v146_v11 = vadd.f32 %v1177_v55, %v145_v63  ;;  %v570_v29 = vadd.f32 %v554_v7, %v473_v16  ;;  %v281_v63 = vadd.f32 %v265_v56, %v149_v59 }
  0xcc   :  { %v280_v49 = vadd.f32 %v264_v61, %v146_v11  ;;  %v586_v42 = vmax.f32 %v570_v29, 0.0  ;;  %v378_v38 = vadd.f32 %v362_v62, %v281_v63 }
  0xcd   :  { %v248_v22 = vpop.permute.xlu1 %247  ;;  %930 = vset.pattern.permute.xlu1 %v940_v1  ;;  %931 = vset.pattern.permute.xlu2 %v939_v0 }
  0xce   :  { %v377_v23 = vadd.f32 %v361_v12, %v280_v49  ;;  %v266_v26 = vmul.f32 %v1217_v15, %v248_v22  ;;  %288 = vperm.xlu1 %930, %v1249_v33   ;;  %381 = vperm.xlu2 %931, %v1143_v45   ;;  %v442_v36 = vpop.permute.xlu2 %441 }
  0xd0   :  { %v474_v28 = vadd.f32 %v458_v19, %v377_v23  ;;  %v282_v13 = vadd.f32 %v266_v26, %v151_v24 }
  0xd2   :  { %v379_v47 = vadd.f32 %v363_v17, %v282_v13  ;;  %v571_v1 = vadd.f32 %v555_v8, %v474_v28 }
  0xd4   :  { %v587_v0 = vmax.f32 %v571_v1, 0.0 }
  0xd6   :  { %v305_v31 = vpop.permute.xlu1 %304  ;;  %933 = vset.pattern.permute.xlu1 %v942_v14  ;;  %v596_v52 = vpack.c.bf16 %v587_v0, %v586_v42  ;;  %934 = vset.pattern.permute.xlu2 %v942_v14  ;;  %v256_v14 = vmul.f32 %v1217_v15, %v1271_v9  ;;  %v546_v9 = vmul.f32 %v1252_v34, %v1296_v32  ;;  %v208_v0 = vpop.permute.xlu0 %207 }
  0xd7   :  { %478 = vperm.xlu1 %933, %v1143_v45   ;;  %482 = vperm.xlu2 %934, %v1249_v33   ;;  %v535_v40 = vpop.permute.xlu2 %534  ;;  %v352_v45 = vmul.f32 %v1231_v21, %v1286_v30  ;;  %v126_v33 = vadd.f32 %v1177_v55, %v125_v20  ;;  %v353_v43 = vmul.f32 %v1231_v21, %v305_v31 }
  0xd8   :  { %847 = vmatmul.msk.bf16.gmra.mxu3 %vm634_vm1, %v596_v52  ;;  %v450_v30 = vmul.f32 %v1240_v27, %v402_v57  ;;  %v460_v32 = vmul.f32 %v1240_v27, %v442_v36  ;;  %v556_v49 = vmul.f32 %v1252_v34, %v535_v40  ;;  %v258_v35 = vmul.f32 %v1217_v15, %v208_v0 }
  0xd9   :  { %v272_v51 = vadd.f32 %v256_v14, %v126_v33  ;;  %v368_v48 = vadd.f32 %v352_v45, %v271_v18 }
  0xda   :  { %v476_v23 = vadd.f32 %v460_v32, %v379_v47  ;;  %v274_v14 = vadd.f32 %v258_v35, %v1212_v10 }
  0xdb   :  { %v369_v54 = vadd.f32 %v353_v43, %v272_v51 }
  0xdd   :  { %v466_v12 = vadd.f32 %v450_v30, %v369_v54 }
  0xde   :  { %v503_v20 = vpop.permute.xlu0 %502 }
  0xdf   :  { %v398_v37 = vpop.permute.xlu1 %397  ;;  %935 = vset.pattern.permute.xlu1 %v941_v4  ;;  %v548_v45 = vmul.f32 %v1252_v34, %v503_v20 }
  0xe0   :  { %v449_v4 = vmul.f32 %v1240_v27, %v398_v37  ;;  %v203_v61 = vpop.permute.xlu2 %202 }
  0xe1   :  { %v257_v31 = vmul.f32 %v1217_v15, %v203_v61 }
  0xe2   :  { %v465_v60 = vadd.f32 %v449_v4, %v368_v48 }
  0xe3   :  { %v273_v37 = vadd.f32 %v257_v31, %v1195_v2 }
  0xe4   :  { %v562_v6 = vadd.f32 %v546_v9, %v465_v60 }
  0xe6   :  { %v578_v24 = vmax.f32 %v562_v6, 0.0  ;;  %v321_v60 = vpop.permute.xlu0 %320 }
  0xe7   :  { %v438_v41 = vpop.permute.xlu1 %437  ;;  %v357_v61 = vmul.f32 %v1231_v21, %v321_v60 }
  0xe8   :  { %v459_v11 = vmul.f32 %v1240_v27, %v438_v41 }
  0xe9   :  { %v313_v22 = vpop.permute.xlu2 %312 }
  0xea   :  { %v475_v17 = vadd.f32 %v459_v11, %v378_v38  ;;  %v355_v39 = vmul.f32 %v1231_v21, %v313_v22 }
  0xec   :  { %v572_v26 = vadd.f32 %v556_v49, %v475_v17  ;;  %v371_v41 = vadd.f32 %v355_v39, %v274_v14 }
  0xee   :  { %v588_v28 = vmax.f32 %v572_v26, 0.0 }
  0xf0   :  { %v499_v3 = vpop.permute.xlu1 %498 }
  0xf1   :  { %v547_v55 = vmul.f32 %v1252_v34, %v499_v3 }
  0xf2   :  { %v410_v1 = vpop.permute.xlu2 %409 }
  0xf3   :  { %v563_v16 = vadd.f32 %v547_v55, %v466_v12  ;;  %v452_v33 = vmul.f32 %v1240_v27, %v410_v1 }
  0xf5   :  { %v579_v19 = vmax.f32 %v563_v16, 0.0  ;;  %v468_v4 = vadd.f32 %v452_v33, %v371_v41 }
  0xf7   :  { %v592_v7 = vpack.c.bf16 %v579_v19, %v578_v24 }
  0xf8   :  { %v539_v44 = vpop.permute.xlu1 %538 }
  0xf9   :  { %v557_v57 = vmul.f32 %v1252_v34, %v539_v44  ;;  %843 = vmatmul.msk.bf16.gmra.mxu1 %vm634_vm1, %v592_v7 }
  0xfb   :  { %v573_v8 = vadd.f32 %v557_v57, %v476_v23  ;;  %v213_v47 = vpop.permute.xlu2 %212 }
  0xfc   :  { %v259_v3 = vmul.f32 %v1217_v15, %v213_v47 }
  0xfd   :  { %v589_v13 = vmax.f32 %v573_v8, 0.0  ;;  %v173_v8 = vpop.permute.xlu0 %172 }
  0xfe   :  { %v275_v38 = vadd.f32 %v259_v3, %v1238_v25  ;;  %v251_v31 = vmul.f32 %v1217_v15, %v173_v8 }
  0xff   :  { %v597_v29 = vpack.c.bf16 %v589_v13, %v588_v28 }
 0x101   :  { %v309_v42 = vpop.permute.xlu1 %308  ;;  %848 = vmatmul.msk.bf16.gmra.mxu3 %vm634_vm1, %v597_v29 }
 0x102   :  { %v354_v52 = vmul.f32 %v1231_v21, %v309_v42 }
 0x104   :  { %v370_v40 = vadd.f32 %v354_v52, %v273_v37  ;;  %v317_v2 = vpop.permute.xlu2 %316  ;;  %v267_v37 = vadd.f32 %v251_v31, %v1182_v58 }
 0x105   :  { %v356_v55 = vmul.f32 %v1231_v21, %v317_v2  ;;  %v386_v29 = vpop.permute.xlu0 %385 }
 0x106   :  { %v446_v52 = vmul.f32 %v1240_v27, %v386_v29 }
 0x107   :  { %v372_v24 = vadd.f32 %v356_v55, %v275_v38 }
 0x10a   :  { %v406_v36 = vpop.permute.xlu1 %405 }
 0x10b   :  { %v451_v50 = vmul.f32 %v1240_v27, %v406_v36 }
 0x10d   :  { %v467_v18 = vadd.f32 %v451_v50, %v370_v40  ;;  %v418_v10 = vpop.permute.xlu2 %417 }
 0x10e   :  { %v454_v6 = vmul.f32 %v1240_v27, %v418_v10 }
 0x10f   :  { %v564_v53 = vadd.f32 %v548_v45, %v467_v18 }
 0x111   :  { %v580_v59 = vmax.f32 %v564_v53, 0.0 }
 0x113   :  { %v507_v43 = vpop.permute.xlu1 %506 }
 0x114   :  { %v549_v56 = vmul.f32 %v1252_v34, %v507_v43 }
 0x116   :  { %v565_v51 = vadd.f32 %v549_v56, %v468_v4  ;;  %v515_v11 = vpop.permute.xlu2 %514 }
 0x117   :  { %v551_v16 = vmul.f32 %v1252_v34, %v515_v11 }
 0x118   :  { %v581_v48 = vmax.f32 %v565_v51, 0.0  ;;  %v938_v51 = vld [vmem:[%s1432_s6] ss:$0 sm:$0xff] }
 0x11a   :  { %v593_v9 = vpack.c.bf16 %v581_v48, %v580_v59 }
 0x11c   :  { %v218_v30 = vpop.permute.xlu1 %217  ;;  %844 = vmatmul.msk.bf16.gmra.mxu1 %vm634_vm1, %v593_v9 }
 0x11d   :  { %v260_v54 = vmul.f32 %v1217_v15, %v218_v30 }
 0x11f   :  { %v276_v62 = vadd.f32 %v260_v54, %v1262_v46  ;;  %v285_v7 = vpop.permute.xlu2 %284 }
 0x120   :  { %v348_v35 = vmul.f32 %v1231_v21, %v285_v7 }
 0x121   :  { %v373_v12 = vadd.f32 %v357_v61, %v276_v62 }
 0x122   :  { %v364_v20 = vadd.f32 %v348_v35, %v267_v37  ;;  %v724_v37 = vld [vmem:[%s1434_s7] sm:$0xff] }
 0x123   :  { %v470_v32 = vadd.f32 %v454_v6, %v373_v12 }
 0x125   :  { %v414_v63 = vpop.permute.xlu1 %413  ;;  %v567_v22 = vadd.f32 %v551_v16, %v470_v32 }
 0x126   :  { %v453_v49 = vmul.f32 %v1240_v27, %v414_v63 }
 0x127   :  { %v583_v26 = vmax.f32 %v567_v22, 0.0 }
 0x128   :  { %v469_v19 = vadd.f32 %v453_v49, %v372_v24  ;;  %v382_v25 = vpop.permute.xlu2 %381 }
 0x129   :  { %v445_v50 = vmul.f32 %v1240_v27, %v382_v25 }
 0x12e   :  { %v511_v17 = vpop.permute.xlu1 %510 }
 0x12f   :  { %v550_v46 = vmul.f32 %v1252_v34, %v511_v17 }
 0x131   :  { %v566_v44 = vadd.f32 %v550_v46, %v469_v19  ;;  %v483_v47 = vpop.permute.xlu2 %482 }
 0x132   :  { %v543_v40 = vmul.f32 %v1252_v34, %v483_v47  ;;  %v673_v27 = vpop.f32.mrf.mxu1 }
 0x133   :  { %v582_v23 = vmax.f32 %v566_v44, 0.0  ;;  %v14_v44 = vstv %s1433_s8 }
 0x134   :  { %15 = vst [vmem:[#allocation2] sm:$0x1] %v14_v44 }
 0x135   :  { %v594_v57 = vpack.c.bf16 %v583_v26, %v582_v23 }
 0x137   :  { %v178_v28 = vpop.permute.xlu1 %177  ;;  %845 = vmatmul.msk.bf16.gmra.mxu1 %vm634_vm1, %v594_v57 }
 0x138   :  { %v252_v13 = vmul.f32 %v1217_v15, %v178_v28 }
 0x13a   :  { %v268_v42 = vadd.f32 %v252_v13, %v1198_v5  ;;  %v461_v5 = vadd.f32 %v445_v50, %v364_v20  ;;  %v675_v2 = vpop.f32.mrf.mxu1 }
 0x13b   :  { %v796_v25 = vld [vmem:[#allocation2] sm:$0x1]  ;;  %v676_v13 = vadd.f32 %v938_v51, %v675_v2 }
 0x13c   :  { %799 = vperm.xlu1 %935, %v796_v25  }
 0x140   :  { %v289_v1 = vpop.permute.xlu1 %288 }
 0x141   :  { %v349_v0 = vmul.f32 %v1231_v21, %v289_v1  ;;  %v674_v1 = vadd.f32 %v938_v51, %v673_v27 }
 0x143   :  { %v365_v36 = vadd.f32 %v349_v0, %v268_v42  ;;  %v711_v42 = vmax.f32 %v676_v13, 0.0  ;;  %v710_v31 = vmax.f32 %v674_v1, 0.0 }
 0x145   :  { %v462_v39 = vadd.f32 %v446_v52, %v365_v36 }
 0x147   :  { %v559_v45 = vadd.f32 %v543_v40, %v462_v39 }
 0x149   :  { %v479_v14 = vpop.permute.xlu1 %478  ;;  %v575_v18 = vmax.f32 %v559_v45, 0.0 }
 0x14a   :  { %v542_v33 = vmul.f32 %v1252_v34, %v479_v14 }
 0x14b   :  { %v693_v21 = vpop.f32.mrf.mxu3 }
 0x14c   :  { %v558_v15 = vadd.f32 %v542_v33, %v461_v5  ;;  %v694_v6 = vadd.f32 %v938_v51, %v693_v21 }
 0x14e   :  { %v574_v41 = vmax.f32 %v558_v15, 0.0  ;;  %v718_v55 = vmax.f32 %v694_v6, 0.0 }
 0x150   :  { %v590_v43 = vpack.c.bf16 %v575_v18, %v574_v41 }
 0x152   :  { %841 = vmatmul.msk.bf16.vlgmr.msrb.gmra.mxu0 %vm634_vm1, %v590_v43 }
 0x153   :  { %v695_v4 = vpop.f32.mrf.mxu3 }
 0x154   :  { %v696_v63 = vadd.f32 %v938_v51, %v695_v4 }
 0x156   :  { %v719_v11 = vmax.f32 %v696_v63, 0.0 }
 0x15b   :  { %v698_v58 = vpop.f32.mrf.mxu3 }
 0x15c   :  { %v699_v60 = vadd.f32 %v938_v51, %v698_v58 }
 0x15e   :  { %v720_v3 = vmax.f32 %v699_v60, 0.0 }
 0x163   :  { %v700_v53 = vpop.f32.mrf.mxu3 }
 0x164   :  { %v701_v10 = vadd.f32 %v938_v51, %v700_v53 }
 0x166   :  { %v721_v61 = vmax.f32 %v701_v10, 0.0 }
 0x176   :  { %v678_v30 = vpop.f32.mrf.mxu1 }
 0x177   :  { %v679_v57 = vadd.f32 %v938_v51, %v678_v30 }
 0x179   :  { %v712_v29 = vmax.f32 %v679_v57, 0.0 }
 0x17e   :  { %v680_v62 = vpop.f32.mrf.mxu1 }
 0x17f   :  { %v681_v23 = vadd.f32 %v938_v51, %v680_v62 }
 0x181   :  { %v713_v8 = vmax.f32 %v681_v23, 0.0 }
 0x184   :  { %v703_v56 = vpop.f32.mrf.mxu3 }
 0x185   :  { %v704_v34 = vadd.f32 %v938_v51, %v703_v56 }
 0x187   :  { %v722_v54 = vmax.f32 %v704_v34, 0.0 }
 0x18c   :  { %v705_v59 = vpop.f32.mrf.mxu3 }
 0x18d   :  { %v706_v48 = vadd.f32 %v938_v51, %v705_v59 }
 0x18f   :  { %v723_v9 = vmax.f32 %v706_v48, 0.0 }
 0x191   :  { %849 = vmatpush.xpose.msk.msrb.mxu2 %vm79_vm0, %v723_v9 }
 0x195   :  { %850 = vmatpush.xpose.msk.msrb.mxu2 %vm79_vm0, %v722_v54 }
 0x199   :  { %851 = vmatpush.xpose.msk.msrb.mxu2 %vm79_vm0, %v721_v61  ;;  %v683_v12 = vpop.f32.mrf.mxu1 }
 0x19a   :  { %v684_v22 = vadd.f32 %v938_v51, %v683_v12 }
 0x19c   :  { %v714_v26 = vmax.f32 %v684_v22, 0.0 }
 0x19d   :  { %852 = vmatpush.xpose.msk.msrb.mxu2 %vm79_vm0, %v720_v3 }
 0x1a1   :  { %853 = vmatpush.xpose.msk.msrb.mxu2 %vm79_vm0, %v719_v11  ;;  %v685_v38 = vpop.f32.mrf.mxu1 }
 0x1a2   :  { %v686_v19 = vadd.f32 %v938_v51, %v685_v38 }
 0x1a4   :  { %v715_v7 = vmax.f32 %v686_v19, 0.0 }
 0x1a5   :  { %854 = vmatpush.xpose.msk.msrb.mxu2 %vm79_vm0, %v718_v55 }
 0x1ae   :  { %v800_v50 = vpop.permute.xlu1 %799 }
 0x1af   :  { %v802_v39 = vperm.slane %v800_v50, 0 }
 0x1b4   :  { %v688_v16 = vpop.f32.mrf.mxu1 }
 0x1b5   :  { %v689_v24 = vadd.f32 %v938_v51, %v688_v16 }
 0x1b7   :  { %v716_v46 = vmax.f32 %v689_v24, 0.0 }
 0x1bc   :  { %v690_v32 = vpop.f32.mrf.mxu1 }
 0x1bd   :  { %v691_v49 = vadd.f32 %v938_v51, %v690_v32 }
 0x1bf   :  { %v717_v17 = vmax.f32 %v691_v49, 0.0 }
 0x1c1   :  { %855 = vmatpush.xpose.msk.msrb.mxu2 %vm79_vm0, %v717_v17 }
 0x1c5   :  { %856 = vmatpush.xpose.msk.msrb.mxu2 %vm79_vm0, %v716_v46 }
 0x1c9   :  { %857 = vmatpush.xpose.msk.msrb.mxu2 %vm79_vm0, %v715_v7 }
 0x1cd   :  { %858 = vmatpush.xpose.msk.msrb.mxu2 %vm79_vm0, %v714_v26 }
 0x1cf   :  { %v668_v28 = vpop.f32.mrf.mxu0 }
 0x1d0   :  { %v669_v36 = vadd.f32 %v938_v51, %v668_v28 }
 0x1d1   :  { %859 = vmatpush.xpose.msk.msrb.mxu2 %vm79_vm0, %v713_v8 }
 0x1d2   :  { %v708_v35 = vmax.f32 %v669_v36, 0.0 }
 0x1d5   :  { %860 = vmatpush.xpose.msk.msrb.mxu2 %vm79_vm0, %v712_v29 }
 0x1d7   :  { %v670_v0 = vpop.f32.mrf.mxu0 }
 0x1d8   :  { %v671_v52 = vadd.f32 %v938_v51, %v670_v0 }
 0x1d9   :  { %861 = vmatpush.xpose.msk.msrb.mxu2 %vm79_vm0, %v711_v42 }
 0x1da   :  { %v709_v47 = vmax.f32 %v671_v52, 0.0 }
 0x1dd   :  { %862 = vmatpush.xpose.msk.msrb.mxu2 %vm79_vm0, %v710_v31 }
 0x1e1   :  { %863 = vmatpush.xpose.msk.msrb.mxu2 %vm79_vm0, %v709_v47 }
 0x1e5   :  { %864 = vmatpush.xpose.msk.msrb.mxu2 %vm79_vm0, %v708_v35 }
 0x1e8   :  { %865 = vmatmul.msk.f32.vlgmr.msrb.gmra.mxu2 %vm79_vm0, %v724_v37 }
 0x26b   :  { %v793_v40 = vpop.f32.mrf.mxu2 }
 0x26c   :  { %v803_v20 = vadd.f32 %v802_v39, %v793_v40 }
 0x26e   :  { %804 = vst [vmem:[%s1435_s9] sm:$0x1] %v803_v20 }

</bundles_post_ra>
